<compile_context>
chip_gen: v7x
topology: tpu7x:2x2x1
jax: 0.10.0
libtpu: 0.0.40
codegen_flags: <defaults>
</compile_context>

<pallas_src>
import functools

import jax
import jax.numpy as jnp
from jax import lax
from jax.experimental import pallas as pl
from jax.experimental.pallas import tpu as pltpu


def _round_up(x, m):
    return ((x + m - 1) // m) * m


def _policy_kernel(x_ref, w1_ref, b1_ref, w2_ref, b2_ref, w3_ref, b3_ref,
                   out_ref, *, act_dim, log_std_low, log_std_high):
    # state arrives as f32; cast to bf16 in-kernel for the MXU dots.
    x = x_ref[...].astype(w1_ref.dtype)                        # bf16 (TM, S)

    # fc1 + ReLU   (bf16 operands, f32 accumulation)
    h = jnp.dot(x, w1_ref[...], preferred_element_type=jnp.float32)
    h = jnp.maximum(h + b1_ref[...], 0.0)

    # fc2 + ReLU
    h = jnp.dot(h.astype(w2_ref.dtype), w2_ref[...],
                preferred_element_type=jnp.float32)
    h = jnp.maximum(h + b2_ref[...], 0.0)

    # fc3
    out = jnp.dot(h.astype(w3_ref.dtype), w3_ref[...],
                  preferred_element_type=jnp.float32)
    out = out + b3_ref[...]                                    # f32 (TM, 2*act)

    # Squashed-normal std parameterization, computed on all lanes (EUP work is
    # free under the MXU-bound regime) and lane-selected so the output stays a
    # single lane-dense slab:
    #   lanes [0, act_dim)       -> mu (raw fc3 output)
    #   lanes [act_dim, 2*act)   -> std = exp(lo + 0.5*(hi-lo)*(tanh(x)+1))
    t = jnp.tanh(out)
    log_std = log_std_low + 0.5 * (log_std_high - log_std_low) * (t + 1.0)
    std = jnp.exp(log_std)

    lane = lax.broadcasted_iota(jnp.int32, out.shape, 1)
    out_ref[...] = jnp.where(lane < act_dim, out, std)


def stochastic_policy_forward(state, params, *, act_dim,
                              log_std_low=-10.0, log_std_high=2.0,
                              tile_m=1024):
    """Runs the stochastic_policy MLP in a single batch-tiled Pallas kernel.

    Returns (mu, std) — the parameters of the squashed_normal distribution.
    """
    w1, b1, w2, b2, w3, b3 = params
    batch, state_dim = state.shape
    hidden = w1.shape[1]
    out_dim = 2 * act_dim

    # Batch tile: multiple of 16 (bf16 sublane packing), capped at tile_m.
    tm = min(tile_m, _round_up(batch, 16))
    grid_m = pl.cdiv(batch, tm)
    # Keep >= 2 grid steps on non-tiny batches so the "parallel" batch axis
    # shards across both TensorCores on v7x (no-op on v5e/v6e).  Also keeps
    # tm <= ~batch/2 (<= 1024 by the cap) so f32/bf16 intermediates fit v7x's
    # 64 MiB VMEM without raising vmem_limit_bytes.
    if grid_m == 1 and batch >= 32:
        tm = _round_up(pl.cdiv(batch, 2), 16)
        grid_m = pl.cdiv(batch, tm)

    kernel = functools.partial(
        _policy_kernel,
        act_dim=act_dim,
        log_std_low=log_std_low,
        log_std_high=log_std_high,
    )

    resident = lambda i: (0, 0)   # weights/biases: same block every grid step

    nbytes = lambda a: a.size * a.dtype.itemsize
    cost = pl.CostEstimate(
        flops=2 * batch * (state_dim * hidden + hidden * hidden
                           + hidden * out_dim),
        transcendentals=2 * batch * out_dim,                   # tanh + exp
        bytes_accessed=(nbytes(state) + sum(nbytes(p) for p in params)
                        + batch * out_dim * 4),
    )

    def build(single_buffer_weights):
        # Constant-index weights need only one buffer; default pipelining would
        # allocate two (dead VMEM — matters most at hidden=2048 / on v7x).
        w_kw = dict(pipeline_mode=pl.Buffered(1)) if single_buffer_weights else {}
        wspec = lambda shape: pl.BlockSpec(shape, resident, **w_kw)
        return pl.pallas_call(
            kernel,
            out_shape=jax.ShapeDtypeStruct((batch, out_dim), jnp.float32),
            grid=(grid_m,),
            in_specs=[
                pl.BlockSpec((tm, state_dim), lambda i: (i, 0)),  # state tile
                wspec((state_dim, hidden)),                       # w1
                wspec((1, hidden)),                               # b1
                wspec((hidden, hidden)),                          # w2
                wspec((1, hidden)),                               # b2
                wspec((hidden, out_dim)),                         # w3
                wspec((1, out_dim)),                              # b3
            ],
            out_specs=pl.BlockSpec((tm, out_dim), lambda i: (i, 0)),
            compiler_params=pltpu.CompilerParams(
                dimension_semantics=("parallel",)),               # v7x megacore
            cost_estimate=cost,
        )

    try:
        out = build(True)(state, w1, b1, w2, b2, w3, b3)
    except Exception:
        # pipeline_mode=pl.Buffered(1) not supported by this JAX build; fall
        # back to default double-buffered resident weights (correct, slightly
        # more VMEM).
        out = build(False)(state, w1, b1, w2, b2, w3, b3)

    # TODO(synk): acting-time path (batch 1-8) is weight-DMA bound; a
    # cross-pallas_call weight prefetch (P10: prior call starts HBM->VMEM
    # copies, returns (DMA semaphore, VMEM ref) with has_side_effects=True and
    # this kernel waits on them) is the remaining win there.
    mu = out[:, :act_dim]
    std = out[:, act_dim:]
    return mu, std


def init_params(key, state_dim, act_dim, hidden):
    """Deterministic init mirroring weight_init: orthogonal weights, zero bias.

    Weights are stored (in_features, out_features) in bf16 for the MXU;
    biases stay in f32 (bias adds and post-processing are f32).
    """
    k1, k2, k3 = jax.random.split(key, 3)
    ortho = jax.nn.initializers.orthogonal()
    w1 = ortho(k1, (state_dim, hidden), jnp.float32).astype(jnp.bfloat16)
    b1 = jnp.zeros((1, hidden), jnp.float32)
    w2 = ortho(k2, (hidden, hidden), jnp.float32).astype(jnp.bfloat16)
    b2 = jnp.zeros((1, hidden), jnp.float32)
    w3 = ortho(k3, (hidden, 2 * act_dim), jnp.float32).astype(jnp.bfloat16)
    b3 = jnp.zeros((1, 2 * act_dim), jnp.float32)
    return (w1, b1, w2, b2, w3, b3)


def _reference_forward(state, params, act_dim, lo=-10.0, hi=2.0):
    """Pure-JAX reference with the same bf16-operand / f32-accumulate numerics."""
    w1, b1, w2, b2, w3, b3 = params
    x = state.astype(w1.dtype)
    h = jax.nn.relu(jnp.dot(x, w1, preferred_element_type=jnp.float32) + b1)
    h = jax.nn.relu(
        jnp.dot(h.astype(w2.dtype), w2, preferred_element_type=jnp.float32) + b2)
    out = jnp.dot(h.astype(w3.dtype), w3,
                  preferred_element_type=jnp.float32) + b3
    mu, log_std = out[:, :act_dim], out[:, act_dim:]
    log_std = jnp.tanh(log_std)
    log_std = lo + 0.5 * (hi - lo) * (log_std + 1.0)
    return mu, jnp.exp(log_std)


if __name__ == "__main__":
    key = jax.random.PRNGKey(0)
    k_s1, k_s2, k_s3, k_params = jax.random.split(key, 4)

    state_dim = 32
    act_dim = 4
    hidden = 256  # small stand-in for the default 1024

    params = init_params(k_params, state_dim, act_dim, hidden)

    # --- small acting-time batch (single 16-row tile, masked writes) ---
    batch = 2
    state = jax.random.normal(k_s1, (batch, state_dim), jnp.float32)
    mu, std = stochastic_policy_forward(state, params, act_dim=act_dim)
    jax.block_until_ready((mu, std))
    mu_ref, std_ref = _reference_forward(state, params, act_dim)
    assert mu.shape == (batch, act_dim) and std.shape == (batch, act_dim)
    assert jnp.allclose(mu, mu_ref, atol=2e-3, rtol=2e-3)
    assert jnp.allclose(std, std_ref, atol=2e-3, rtol=2e-3)

    # --- ragged batch exercising the grid without any wrapper-side padding
    #     (3 tiles of 16 rows; last tile partially masked) ---
    batch2 = 33
    state2 = jax.random.normal(k_s2, (batch2, state_dim), jnp.float32)
    mu2, std2 = stochastic_policy_forward(state2, params, act_dim=act_dim,
                                          tile_m=16)
    jax.block_until_ready((mu2, std2))
    mu2_ref, std2_ref = _reference_forward(state2, params, act_dim)
    assert mu2.shape == (batch2, act_dim) and std2.shape == (batch2, act_dim)
    assert jnp.allclose(mu2, mu2_ref, atol=2e-3, rtol=2e-3)
    assert jnp.allclose(std2, std2_ref, atol=2e-3, rtol=2e-3)

    # --- batch >= 32 with the default tile cap: exercises the grid_m >= 2
    #     split used for v7x megacore sharding ---
    batch3 = 40
    state3 = jax.random.normal(k_s3, (batch3, state_dim), jnp.float32)
    mu3, std3 = stochastic_policy_forward(state3, params, act_dim=act_dim)
    jax.block_until_ready((mu3, std3))
    mu3_ref, std3_ref = _reference_forward(state3, params, act_dim)
    assert mu3.shape == (batch3, act_dim) and std3.shape == (batch3, act_dim)
    assert jnp.allclose(mu3, mu3_ref, atol=2e-3, rtol=2e-3)
    assert jnp.allclose(std3, std3_ref, atol=2e-3, rtol=2e-3)

    # TODO(synk): the squashed_normal / beta_dist distribution objects
    # (rsample, log_prob, TanhTransform) have no Pallas equivalent; only the
    # forward-pass parameters (mu, std) are computed here.  The 'beta'
    # dist_impl branch is likewise not implemented.
    print("KERNEL_OK")
</pallas_src>

<mosaic_0001>
module attributes {stable_mosaic.version = 11 : i64} {
  func.func @_policy_kernel(%arg0: i32, %arg1: memref<16x32xf32, #tpu.memory_space<vmem>>, %arg2: memref<32x256xbf16, #tpu.memory_space<vmem>>, %arg3: memref<1x256xf32, #tpu.memory_space<vmem>>, %arg4: memref<256x256xbf16, #tpu.memory_space<vmem>>, %arg5: memref<1x256xf32, #tpu.memory_space<vmem>>, %arg6: memref<256x8xbf16, #tpu.memory_space<vmem>>, %arg7: memref<1x8xf32, #tpu.memory_space<vmem>>, %arg8: memref<16x8xf32, #tpu.memory_space<vmem>>) attributes {dimension_semantics = [#tpu.dimension_semantics<parallel>], iteration_bounds = array<i64: 1>, scalar_prefetch = 0 : i64, scratch_operands = 0 : i64, tpu.core_type = #tpu.core_type<tc>, window_params = [{transform_indices = @transform_0, window_bounds = array<i64: 16, 32>}, {pipeline_mode = #tpu.pipeline_mode<synchronous>, transform_indices = @transform_1, window_bounds = array<i64: 32, 256>}, {pipeline_mode = #tpu.pipeline_mode<synchronous>, transform_indices = @transform_2, window_bounds = array<i64: 1, 256>}, {pipeline_mode = #tpu.pipeline_mode<synchronous>, transform_indices = @transform_3, window_bounds = array<i64: 256, 256>}, {pipeline_mode = #tpu.pipeline_mode<synchronous>, transform_indices = @transform_4, window_bounds = array<i64: 1, 256>}, {pipeline_mode = #tpu.pipeline_mode<synchronous>, transform_indices = @transform_5, window_bounds = array<i64: 256, 8>}, {pipeline_mode = #tpu.pipeline_mode<synchronous>, transform_indices = @transform_6, window_bounds = array<i64: 1, 8>}, {transform_indices = @transform_7, window_bounds = array<i64: 16, 8>}]} {
    %c0 = arith.constant 0 : index
    %c0_0 = arith.constant 0 : index
    %0 = vector.load %arg1[%c0, %c0_0] : memref<16x32xf32, #tpu.memory_space<vmem>>, vector<16x32xf32>
    %1 = arith.truncf %0 : vector<16x32xf32> to vector<16x32xbf16>
    %c0_1 = arith.constant 0 : index
    %c0_2 = arith.constant 0 : index
    %2 = vector.load %arg2[%c0_1, %c0_2] : memref<32x256xbf16, #tpu.memory_space<vmem>>, vector<32x256xbf16>
    %cst = arith.constant dense<0.000000e+00> : vector<16x256xf32>
    %3 = tpu.matmul %1, %2, %cst {dimension_numbers = #tpu.dot_dimension_numbers<[1], [0], [0], [1], [0, 0, 1, 1], [], []>} : vector<16x32xbf16>, vector<32x256xbf16>, vector<16x256xf32> -> vector<16x256xf32>
    %c0_3 = arith.constant 0 : index
    %c0_4 = arith.constant 0 : index
    %4 = vector.load %arg3[%c0_3, %c0_4] : memref<1x256xf32, #tpu.memory_space<vmem>>, vector<1x256xf32>
    %5 = vector.broadcast %4 : vector<1x256xf32> to vector<16x256xf32>
    %6 = arith.addf %3, %5 : vector<16x256xf32>
    %cst_5 = arith.constant 0.000000e+00 : f32
    %7 = vector.broadcast %cst_5 : f32 to vector<16x256xf32>
    %8 = arith.maximumf %6, %7 : vector<16x256xf32>
    %9 = arith.truncf %8 : vector<16x256xf32> to vector<16x256xbf16>
    %c0_6 = arith.constant 0 : index
    %c0_7 = arith.constant 0 : index
    %10 = vector.load %arg4[%c0_6, %c0_7] : memref<256x256xbf16, #tpu.memory_space<vmem>>, vector<256x256xbf16>
    %cst_8 = arith.constant dense<0.000000e+00> : vector<16x256xf32>
    %11 = tpu.matmul %9, %10, %cst_8 {dimension_numbers = #tpu.dot_dimension_numbers<[1], [0], [0], [1], [0, 0, 1, 1], [], []>} : vector<16x256xbf16>, vector<256x256xbf16>, vector<16x256xf32> -> vector<16x256xf32>
    %c0_9 = arith.constant 0 : index
    %c0_10 = arith.constant 0 : index
    %12 = vector.load %arg5[%c0_9, %c0_10] : memref<1x256xf32, #tpu.memory_space<vmem>>, vector<1x256xf32>
    %13 = vector.broadcast %12 : vector<1x256xf32> to vector<16x256xf32>
    %14 = arith.addf %11, %13 : vector<16x256xf32>
    %cst_11 = arith.constant 0.000000e+00 : f32
    %15 = vector.broadcast %cst_11 : f32 to vector<16x256xf32>
    %16 = arith.maximumf %14, %15 : vector<16x256xf32>
    %17 = arith.truncf %16 : vector<16x256xf32> to vector<16x256xbf16>
    %c0_12 = arith.constant 0 : index
    %c0_13 = arith.constant 0 : index
    %18 = vector.load %arg6[%c0_12, %c0_13] : memref<256x8xbf16, #tpu.memory_space<vmem>>, vector<256x8xbf16>
    %cst_14 = arith.constant dense<0.000000e+00> : vector<16x8xf32>
    %19 = tpu.matmul %17, %18, %cst_14 {dimension_numbers = #tpu.dot_dimension_numbers<[1], [0], [0], [1], [0, 0, 1, 1], [], []>} : vector<16x256xbf16>, vector<256x8xbf16>, vector<16x8xf32> -> vector<16x8xf32>
    %c0_15 = arith.constant 0 : index
    %c0_16 = arith.constant 0 : index
    %20 = vector.load %arg7[%c0_15, %c0_16] : memref<1x8xf32, #tpu.memory_space<vmem>>, vector<1x8xf32>
    %21 = vector.broadcast %20 : vector<1x8xf32> to vector<16x8xf32>
    %22 = arith.addf %19, %21 : vector<16x8xf32>
    %23 = math.tanh %22 : vector<16x8xf32>
    %cst_17 = arith.constant 1.000000e+00 : f32
    %24 = vector.broadcast %cst_17 : f32 to vector<16x8xf32>
    %25 = arith.addf %23, %24 : vector<16x8xf32>
    %cst_18 = arith.constant 6.000000e+00 : f32
    %26 = vector.broadcast %cst_18 : f32 to vector<16x8xf32>
    %27 = arith.mulf %26, %25 : vector<16x8xf32>
    %cst_19 = arith.constant -1.000000e+01 : f32
    %28 = vector.broadcast %cst_19 : f32 to vector<16x8xf32>
    %29 = arith.addf %28, %27 : vector<16x8xf32>
    %30 = math.exp %29 : vector<16x8xf32>
    %31 = tpu.iota {dimensions = array<i32: 1>} : vector<16x8xi32>
    %c4_i32 = arith.constant 4 : i32
    %32 = vector.broadcast %c4_i32 : i32 to vector<16x8xi32>
    %33 = arith.cmpi slt, %31, %32 : vector<16x8xi32>
    %34 = arith.select %33, %22, %30 : vector<16x8xi1>, vector<16x8xf32>
    %c0_20 = arith.constant 0 : index
    %c0_21 = arith.constant 0 : index
    %35 = vector.load %arg8[%c0_20, %c0_21] : memref<16x8xf32, #tpu.memory_space<vmem>>, vector<16x8xf32>
    tpu.vector_store %arg8[%c0_20, %c0_21], %34 {strides = array<i32>} : memref<16x8xf32, #tpu.memory_space<vmem>>, vector<16x8xf32>,
    return
  }
  func.func @transform_0(%arg0: i32) -> (i32, i32) {
    %c0_i32 = arith.constant 0 : i32
    %c0_i32_0 = arith.constant 0 : i32
    return %arg0, %c0_i32 : i32, i32
  }
  func.func @transform_1(%arg0: i32) -> (i32, i32) {
    %c0_i32 = arith.constant 0 : i32
    %c0_i32_0 = arith.constant 0 : i32
    %c0_i32_1 = arith.constant 0 : i32
    return %c0_i32, %c0_i32_0 : i32, i32
  }
  func.func @transform_2(%arg0: i32) -> (i32, i32) {
    %c0_i32 = arith.constant 0 : i32
    %c0_i32_0 = arith.constant 0 : i32
    %c0_i32_1 = arith.constant 0 : i32
    return %c0_i32, %c0_i32_0 : i32, i32
  }
  func.func @transform_3(%arg0: i32) -> (i32, i32) {
    %c0_i32 = arith.constant 0 : i32
    %c0_i32_0 = arith.constant 0 : i32
    %c0_i32_1 = arith.constant 0 : i32
    return %c0_i32, %c0_i32_0 : i32, i32
  }
  func.func @transform_4(%arg0: i32) -> (i32, i32) {
    %c0_i32 = arith.constant 0 : i32
    %c0_i32_0 = arith.constant 0 : i32
    %c0_i32_1 = arith.constant 0 : i32
    return %c0_i32, %c0_i32_0 : i32, i32
  }
  func.func @transform_5(%arg0: i32) -> (i32, i32) {
    %c0_i32 = arith.constant 0 : i32
    %c0_i32_0 = arith.constant 0 : i32
    %c0_i32_1 = arith.constant 0 : i32
    return %c0_i32, %c0_i32_0 : i32, i32
  }
  func.func @transform_6(%arg0: i32) -> (i32, i32) {
    %c0_i32 = arith.constant 0 : i32
    %c0_i32_0 = arith.constant 0 : i32
    %c0_i32_1 = arith.constant 0 : i32
    return %c0_i32, %c0_i32_0 : i32, i32
  }
  func.func @transform_7(%arg0: i32) -> (i32, i32) {
    %c0_i32 = arith.constant 0 : i32
    %c0_i32_0 = arith.constant 0 : i32
    return %arg0, %c0_i32 : i32, i32
  }
}

module attributes {stable_mosaic.version = 11 : i64} {
  func.func @_policy_kernel(%arg0: i32, %arg1: memref<16x32xf32, #tpu.memory_space<vmem>>, %arg2: memref<32x256xbf16, #tpu.memory_space<vmem>>, %arg3: memref<1x256xf32, #tpu.memory_space<vmem>>, %arg4: memref<256x256xbf16, #tpu.memory_space<vmem>>, %arg5: memref<1x256xf32, #tpu.memory_space<vmem>>, %arg6: memref<256x8xbf16, #tpu.memory_space<vmem>>, %arg7: memref<1x8xf32, #tpu.memory_space<vmem>>, %arg8: memref<16x8xf32, #tpu.memory_space<vmem>>) attributes {dimension_semantics = [#tpu.dimension_semantics<parallel>], iteration_bounds = array<i64: 1>, scalar_prefetch = 0 : i64, scratch_operands = 0 : i64, tpu.core_type = #tpu.core_type<tc>, window_params = [{transform_indices = @transform_0, window_bounds = array<i64: 16, 32>}, {pipeline_mode = #tpu.pipeline_mode<synchronous>, transform_indices = @transform_1, window_bounds = array<i64: 32, 256>}, {pipeline_mode = #tpu.pipeline_mode<synchronous>, transform_indices = @transform_2, window_bounds = array<i64: 1, 256>}, {pipeline_mode = #tpu.pipeline_mode<synchronous>, transform_indices = @transform_3, window_bounds = array<i64: 256, 256>}, {pipeline_mode = #tpu.pipeline_mode<synchronous>, transform_indices = @transform_4, window_bounds = array<i64: 1, 256>}, {pipeline_mode = #tpu.pipeline_mode<synchronous>, transform_indices = @transform_5, window_bounds = array<i64: 256, 8>}, {pipeline_mode = #tpu.pipeline_mode<synchronous>, transform_indices = @transform_6, window_bounds = array<i64: 1, 8>}, {transform_indices = @transform_7, window_bounds = array<i64: 16, 8>}]} {
    %c0 = arith.constant 0 : index
    %c0_0 = arith.constant 0 : index
    %0 = vector.load %arg1[%c0, %c0_0] : memref<16x32xf32, #tpu.memory_space<vmem>>, vector<16x32xf32>
    %1 = arith.truncf %0 : vector<16x32xf32> to vector<16x32xbf16>
    %c0_1 = arith.constant 0 : index
    %c0_2 = arith.constant 0 : index
    %2 = vector.load %arg2[%c0_1, %c0_2] : memref<32x256xbf16, #tpu.memory_space<vmem>>, vector<32x256xbf16>
    %cst = arith.constant dense<0.000000e+00> : vector<16x256xf32>
    %3 = tpu.matmul %1, %2, %cst {dimension_numbers = #tpu.dot_dimension_numbers<[1], [0], [0], [1], [0, 0, 1, 1], [], []>} : vector<16x32xbf16>, vector<32x256xbf16>, vector<16x256xf32> -> vector<16x256xf32>
    %c0_3 = arith.constant 0 : index
    %c0_4 = arith.constant 0 : index
    %4 = vector.load %arg3[%c0_3, %c0_4] : memref<1x256xf32, #tpu.memory_space<vmem>>, vector<1x256xf32>
    %5 = vector.broadcast %4 : vector<1x256xf32> to vector<16x256xf32>
    %6 = arith.addf %3, %5 : vector<16x256xf32>
    %cst_5 = arith.constant 0.000000e+00 : f32
    %7 = vector.broadcast %cst_5 : f32 to vector<16x256xf32>
    %8 = arith.maximumf %6, %7 : vector<16x256xf32>
    %9 = arith.truncf %8 : vector<16x256xf32> to vector<16x256xbf16>
    %c0_6 = arith.constant 0 : index
    %c0_7 = arith.constant 0 : index
    %10 = vector.load %arg4[%c0_6, %c0_7] : memref<256x256xbf16, #tpu.memory_space<vmem>>, vector<256x256xbf16>
    %cst_8 = arith.constant dense<0.000000e+00> : vector<16x256xf32>
    %11 = tpu.matmul %9, %10, %cst_8 {dimension_numbers = #tpu.dot_dimension_numbers<[1], [0], [0], [1], [0, 0, 1, 1], [], []>} : vector<16x256xbf16>, vector<256x256xbf16>, vector<16x256xf32> -> vector<16x256xf32>
    %c0_9 = arith.constant 0 : index
    %c0_10 = arith.constant 0 : index
    %12 = vector.load %arg5[%c0_9, %c0_10] : memref<1x256xf32, #tpu.memory_space<vmem>>, vector<1x256xf32>
    %13 = vector.broadcast %12 : vector<1x256xf32> to vector<16x256xf32>
    %14 = arith.addf %11, %13 : vector<16x256xf32>
    %cst_11 = arith.constant 0.000000e+00 : f32
    %15 = vector.broadcast %cst_11 : f32 to vector<16x256xf32>
    %16 = arith.maximumf %14, %15 : vector<16x256xf32>
    %17 = arith.truncf %16 : vector<16x256xf32> to vector<16x256xbf16>
    %c0_12 = arith.constant 0 : index
    %c0_13 = arith.constant 0 : index
    %18 = vector.load %arg6[%c0_12, %c0_13] : memref<256x8xbf16, #tpu.memory_space<vmem>>, vector<256x8xbf16>
    %cst_14 = arith.constant dense<0.000000e+00> : vector<16x8xf32>
    %19 = tpu.matmul %17, %18, %cst_14 {dimension_numbers = #tpu.dot_dimension_numbers<[1], [0], [0], [1], [0, 0, 1, 1], [], []>} : vector<16x256xbf16>, vector<256x8xbf16>, vector<16x8xf32> -> vector<16x8xf32>
    %c0_15 = arith.constant 0 : index
    %c0_16 = arith.constant 0 : index
    %20 = vector.load %arg7[%c0_15, %c0_16] : memref<1x8xf32, #tpu.memory_space<vmem>>, vector<1x8xf32>
    %21 = vector.broadcast %20 : vector<1x8xf32> to vector<16x8xf32>
    %22 = arith.addf %19, %21 : vector<16x8xf32>
    %23 = math.tanh %22 : vector<16x8xf32>
    %cst_17 = arith.constant 1.000000e+00 : f32
    %24 = vector.broadcast %cst_17 : f32 to vector<16x8xf32>
    %25 = arith.addf %23, %24 : vector<16x8xf32>
    %cst_18 = arith.constant 6.000000e+00 : f32
    %26 = vector.broadcast %cst_18 : f32 to vector<16x8xf32>
    %27 = arith.mulf %26, %25 : vector<16x8xf32>
    %cst_19 = arith.constant -1.000000e+01 : f32
    %28 = vector.broadcast %cst_19 : f32 to vector<16x8xf32>
    %29 = arith.addf %28, %27 : vector<16x8xf32>
    %30 = math.exp %29 : vector<16x8xf32>
    %31 = tpu.iota {dimensions = array<i32: 1>} : vector<16x8xi32>
    %c4_i32 = arith.constant 4 : i32
    %32 = vector.broadcast %c4_i32 : i32 to vector<16x8xi32>
    %33 = arith.cmpi slt, %31, %32 : vector<16x8xi32>
    %34 = arith.select %33, %22, %30 : vector<16x8xi1>, vector<16x8xf32>
    %c0_20 = arith.constant 0 : index
    %c0_21 = arith.constant 0 : index
    %35 = vector.load %arg8[%c0_20, %c0_21] : memref<16x8xf32, #tpu.memory_space<vmem>>, vector<16x8xf32>
    tpu.vector_store %arg8[%c0_20, %c0_21], %34 {strides = array<i32>} : memref<16x8xf32, #tpu.memory_space<vmem>>, vector<16x8xf32>,
    return
  }
  func.func @transform_0(%arg0: i32) -> (i32, i32) {
    %c0_i32 = arith.constant 0 : i32
    %c0_i32_0 = arith.constant 0 : i32
    return %arg0, %c0_i32 : i32, i32
  }
  func.func @transform_1(%arg0: i32) -> (i32, i32) {
    %c0_i32 = arith.constant 0 : i32
    %c0_i32_0 = arith.constant 0 : i32
    %c0_i32_1 = arith.constant 0 : i32
    return %c0_i32, %c0_i32_0 : i32, i32
  }
  func.func @transform_2(%arg0: i32) -> (i32, i32) {
    %c0_i32 = arith.constant 0 : i32
    %c0_i32_0 = arith.constant 0 : i32
    %c0_i32_1 = arith.constant 0 : i32
    return %c0_i32, %c0_i32_0 : i32, i32
  }
  func.func @transform_3(%arg0: i32) -> (i32, i32) {
    %c0_i32 = arith.constant 0 : i32
    %c0_i32_0 = arith.constant 0 : i32
    %c0_i32_1 = arith.constant 0 : i32
    return %c0_i32, %c0_i32_0 : i32, i32
  }
  func.func @transform_4(%arg0: i32) -> (i32, i32) {
    %c0_i32 = arith.constant 0 : i32
    %c0_i32_0 = arith.constant 0 : i32
    %c0_i32_1 = arith.constant 0 : i32
    return %c0_i32, %c0_i32_0 : i32, i32
  }
  func.func @transform_5(%arg0: i32) -> (i32, i32) {
    %c0_i32 = arith.constant 0 : i32
    %c0_i32_0 = arith.constant 0 : i32
    %c0_i32_1 = arith.constant 0 : i32
    return %c0_i32, %c0_i32_0 : i32, i32
  }
  func.func @transform_6(%arg0: i32) -> (i32, i32) {
    %c0_i32 = arith.constant 0 : i32
    %c0_i32_0 = arith.constant 0 : i32
    %c0_i32_1 = arith.constant 0 : i32
    return %c0_i32, %c0_i32_0 : i32, i32
  }
  func.func @transform_7(%arg0: i32) -> (i32, i32) {
    %c0_i32 = arith.constant 0 : i32
    %c0_i32_0 = arith.constant 0 : i32
    return %arg0, %c0_i32 : i32, i32
  }
}

</mosaic_0001>

<bundles_post_ra>
// kernel: tpu_custom_call.1
= control target key start
LH: loop header
LB: loop body
LE: loop exit
PB: predicated region body
PF: predicated region fallthrough
CT: control target
= control target key end

     0   :  { %12 = vsyncpa [#allocation3], 0  ;;  %s957_s0 = inlined_call_operand.vmem [shape: f32[2,32], index: 0, kind: input, shape index: {}]   ;;  %s958_s1 = inlined_call_operand.vmem [shape: bf16[32,256], index: 1, kind: input, shape index: {}]   ;;  %s959_s2 = inlined_call_operand.vmem [shape: f32[1,256], index: 2, kind: input, shape index: {}]   ;;  %s960_s3 = inlined_call_operand.hbm [shape: bf16[256,256], index: 3, kind: input, shape index: {}]   ;;  %s961_s4 = inlined_call_operand.vmem [shape: f32[1,256], index: 4, kind: input, shape index: {}]   ;;  %s962_s5 = inlined_call_operand.vmem [shape: bf16[256,8], index: 5, kind: input, shape index: {}]   ;;  %s963_s6 = inlined_call_operand.vmem [shape: f32[1,8], index: 6, kind: input, shape index: {}]   ;;  %s964_s7 = inlined_call_operand.hbm [shape: f32[2,8], index: 7, kind: output, shape index: {}]  }
   0x1   :  { %13 = vsyncpa [#allocation4], 0  ;;  %s809_s24 = smov [#allocation2]   ;;  %s761_s28 = scalar_lea.hbm %s960_s3, 4096 }
   0x2   :  { %s25_s25 = sshll.u32 %s809_s24, 4  ;;  %p762_p0 = scmp.ne.s32.totalorder %s960_s3, %s761_s28  ;;  %s26_s25 = int_to_ptr.vmem [resolvable:$true] %s25_s25 }
   0x3   :  { %p765_p1 = scmp.lt.u32.totalorder %s761_s28, %s960_s3 }
   0x5   :  { %p767_p2 = pnand %p765_p1, %p762_p0 }
   0x7   :  { %770 = shalt.err (!%p767_p2)
}
   0x8   :  { %s771_s10 = scalar_lea.vmem %s26_s25, 4096  ;;  %p776_p4 = scmp.lt.s32.totalorder %s26_s25, %s26_s25 }
   0x9   :  { %p772_p3 = scmp.ne.s32.totalorder %s26_s25, %s771_s10  ;;  %p777_p5 = scmp.lt.s32.totalorder %s771_s10, %s771_s10 }
   0xb   :  { %p778_p6 = por %p777_p5, %p776_p4 }
   0xd   :  { %p779_p7 = pnand %p778_p6, %p772_p3 }
   0xf   :  { %782 = shalt.err (!%p779_p7)
}
  0x10   :  { %s810_s11 = smov 128   ;;  %s811_s12 = smov 8  }
  0x11   :  { %31 = dma.hbm_to_vmem [thread:$0]  %s960_s3, 4096, %s26_s25, [#allocation3], %s810_s11, %s810_s11, %s811_s12  }
  0x12   :  { %805 = dma.done.wait [#allocation3], 4096  }
  0x13   :  { %806 = vsyncadd [#allocation3], 4294963200  ;;  %v812_v0 = vmov 0   ;;  %v683_v1 = vld [vmem:[%s958_s1 + $0x4] ss:$8 sps:$4 sm:$0xff]   ;;  %vm81_vm0 = vcmask 261120   ;;  %v51_v51 = vlaneseq }
  0x14   :  { %117 = vmatprep.mubr.bf16.mxu0 %v812_v0  ;;  %v685_v2 = vld [vmem:[%s958_s1] ss:$8 sps:$4 sm:$0xff]   ;;  %85 = vmatprep.subr.bf16.mxu0 %v683_v1  ;;  %v686_v3 = vld [vmem:[%s958_s1 + $0x14] ss:$8 sps:$4 sm:$0xff]   ;;  %v688_v4 = vld [vmem:[%s958_s1 + $0x10] ss:$8 sps:$4 sm:$0xff]  }
  0x15   :  { %v42_v5 = vld [vmem:[%s957_s0] sm:$0xff]  ;;  %86 = vmatpush1.bf16.msra.mxu0 %v685_v2  ;;  %v43_v6 = vld [vmem:[%s957_s0 + $0x8] sm:$0xff]  ;;  %v692_v9 = vld [vmem:[#allocation2 + $0x14] ss:$8 sps:$4 sm:$0xff]   ;;  %v52_v52 = vshrl.u32 %v51_v51, 7  ;;  %vm580_vm2 = vcmask 64512  }
  0x16   :  { %87 = vmatprep.subr.bf16.mxu0 %v686_v3  ;;  %v689_v7 = vld [vmem:[#allocation2 + $0x4] ss:$8 sps:$4 sm:$0xff]   ;;  %v691_v8 = vld [vmem:[#allocation2] ss:$8 sps:$4 sm:$0xff]   ;;  %v44_v10 = vpack.c.bf16 %v43_v6, %v42_v5  ;;  %v694_v11 = vld [vmem:[#allocation2 + $0x10] ss:$8 sps:$4 sm:$0xff]  }
  0x17   :  { %338 = vmatprep.subr.bf16.mxu1 %v689_v7  ;;  %v695_v12 = vld [vmem:[#allocation2 + $0x24] ss:$8 sps:$4 sm:$0xff]   ;;  %v697_v13 = vld [vmem:[#allocation2 + $0x20] ss:$8 sps:$4 sm:$0xff]   ;;  %v698_v14 = vld [vmem:[#allocation2 + $0x34] ss:$8 sps:$4 sm:$0xff]  }
  0x18   :  { %339 = vmatpush1.bf16.msra.mxu1 %v691_v8  ;;  %v700_v15 = vld [vmem:[#allocation2 + $0x30] ss:$8 sps:$4 sm:$0xff]   ;;  %v701_v16 = vld [vmem:[#allocation2 + $0x44] ss:$8 sps:$4 sm:$0xff]   ;;  %v703_v17 = vld [vmem:[#allocation2 + $0x40] ss:$8 sps:$4 sm:$0xff]  }
  0x19   :  { %88 = vmatpush1.bf16.msra.mxu0 %v688_v4  ;;  %340 = vmatprep.subr.bf16.mxu1 %v692_v9  ;;  %v704_v18 = vld [vmem:[#allocation2 + $0x54] ss:$8 sps:$4 sm:$0xff]   ;;  %v706_v19 = vld [vmem:[#allocation2 + $0x50] ss:$8 sps:$4 sm:$0xff]   ;;  %v707_v20 = vld [vmem:[#allocation2 + $0x64] ss:$8 sps:$4 sm:$0xff]  }
  0x1a   :  { %v709_v21 = vld [vmem:[#allocation2 + $0x60] ss:$8 sps:$4 sm:$0xff]   ;;  %v710_v22 = vld [vmem:[#allocation2 + $0x74] ss:$8 sps:$4 sm:$0xff]   ;;  %v712_v23 = vld [vmem:[#allocation2 + $0x70] ss:$8 sps:$4 sm:$0xff]  }
  0x1b   :  { %v713_v24 = vld [vmem:[#allocation2 + $0x84] ss:$8 sps:$4 sm:$0xff]   ;;  %v715_v25 = vld [vmem:[#allocation2 + $0x80] ss:$8 sps:$4 sm:$0xff]   ;;  %v716_v26 = vld [vmem:[#allocation2 + $0x94] ss:$8 sps:$4 sm:$0xff]  }
  0x1c   :  { %604 = vmatmul.mubr.msk.bf16.vlgmr.msra.gmra.mrb[0].mxu0 %vm81_vm0, %v44_v10  ;;  %341 = vmatpush1.bf16.msra.mxu1 %v694_v11  ;;  %v718_v27 = vld [vmem:[#allocation2 + $0x90] ss:$8 sps:$4 sm:$0xff]   ;;  %v719_v28 = vld [vmem:[#allocation2 + $0xa4] ss:$8 sps:$4 sm:$0xff]   ;;  %v721_v29 = vld [vmem:[#allocation2 + $0xa0] ss:$8 sps:$4 sm:$0xff]  }
  0x1d   :  { %342 = vmatprep.subr.bf16.mxu1 %v695_v12  ;;  %v722_v30 = vld [vmem:[#allocation2 + $0xb4] ss:$8 sps:$4 sm:$0xff]   ;;  %v724_v31 = vld [vmem:[#allocation2 + $0xb0] ss:$8 sps:$4 sm:$0xff]   ;;  %v725_v32 = vld [vmem:[#allocation2 + $0xc4] ss:$8 sps:$4 sm:$0xff]  }
  0x1e   :  { %v727_v33 = vld [vmem:[#allocation2 + $0xc0] ss:$8 sps:$4 sm:$0xff]   ;;  %v728_v34 = vld [vmem:[#allocation2 + $0xd4] ss:$8 sps:$4 sm:$0xff]   ;;  %v730_v35 = vld [vmem:[#allocation2 + $0xd0] ss:$8 sps:$4 sm:$0xff]  }
  0x1f   :  { %v731_v36 = vld [vmem:[#allocation2 + $0xe4] ss:$8 sps:$4 sm:$0xff]   ;;  %v733_v37 = vld [vmem:[#allocation2 + $0xe0] ss:$8 sps:$4 sm:$0xff]   ;;  %v734_v38 = vld [vmem:[#allocation2 + $0xf4] ss:$8 sps:$4 sm:$0xff]  }
  0x20   :  { %343 = vmatpush1.bf16.msra.mxu1 %v697_v13  ;;  %v736_v39 = vld [vmem:[#allocation2 + $0xf0] ss:$8 sps:$4 sm:$0xff]   ;;  %v737_v40 = vld [vmem:[%s962_s5 + $0x40] sm:$0xff]   ;;  %v739_v42 = vld [vmem:[%s962_s5 + $0x48] sm:$0xff]   ;;  %v53_v53 = vsub.s32 0, %v52_v52  ;;  %v57_v55 = vsub.s32 1, %v52_v52 }
  0x21   :  { %344 = vmatprep.subr.bf16.mxu1 %v698_v14  ;;  %v738_v41 = vld [vmem:[%s962_s5] sm:$0xff]   ;;  %654 = vmatprep.subr.bf16.mxu0 %v737_v40  ;;  %v740_v43 = vld [vmem:[%s962_s5 + $0x8] sm:$0xff]   ;;  %v741_v44 = vld [vmem:[%s962_s5 + $0x50] sm:$0xff]  }
  0x22   :  { %655 = vmatpush3.bf16.msra.mxu0 %v738_v41  ;;  %v742_v45 = vld [vmem:[%s962_s5 + $0x10] sm:$0xff]   ;;  %v743_v46 = vld [vmem:[%s962_s5 + $0x58] sm:$0xff]   ;;  %v745_v48 = vld [vmem:[%s962_s5 + $0x60] sm:$0xff]  }
  0x23   :  { %656 = vmatprep.subr.bf16.mxu0 %v739_v42  ;;  %v744_v47 = vld [vmem:[%s962_s5 + $0x18] sm:$0xff]   ;;  %v746_v49 = vld [vmem:[%s962_s5 + $0x20] sm:$0xff]   ;;  %v747_v50 = vld [vmem:[%s962_s5 + $0x68] sm:$0xff]  }
  0x24   :  { %345 = vmatpush1.bf16.msra.mxu1 %v700_v15  ;;  %v49_v54 = vld [vmem:[%s959_s2] sm:$0x3]  ;;  %v748_v8 = vld [vmem:[%s962_s5 + $0x28] sm:$0xff]   ;;  %v749_v9 = vld [vmem:[%s962_s5 + $0x70] sm:$0xff]  }
  0x25   :  { %346 = vmatprep.subr.bf16.mxu1 %v701_v16  ;;  %v54_v56 = vrot.slane %v49_v54, %v53_v53  ;;  %v58_v57 = vrot.slane %v49_v54, %v57_v55  ;;  %v750_v10 = vld [vmem:[%s962_s5 + $0x30] sm:$0xff]   ;;  %v751_v11 = vld [vmem:[%s962_s5 + $0x78] sm:$0xff]   ;;  %v166_v13 = vld [vmem:[%s961_s4] sm:$0x3] }
  0x26   :  { %657 = vmatpush3.bf16.msra.mxu0 %v740_v43  ;;  %v752_v12 = vld [vmem:[%s962_s5 + $0x38] sm:$0xff]   ;;  %v171_v14 = vrot.slane %v166_v13, %v53_v53  ;;  %v175_v15 = vrot.slane %v166_v13, %v57_v55 }
  0x27   :  { %658 = vmatprep.subr.bf16.mxu0 %v741_v44 }
  0x28   :  { %347 = vmatpush1.bf16.msra.mxu1 %v703_v17 }
  0x29   :  { %348 = vmatprep.subr.bf16.mxu1 %v704_v18 }
  0x2a   :  { %659 = vmatpush3.bf16.msra.mxu0 %v742_v45 }
  0x2b   :  { %660 = vmatprep.subr.bf16.mxu0 %v743_v46 }
  0x2c   :  { %349 = vmatpush1.bf16.msra.mxu1 %v706_v19 }
  0x2d   :  { %350 = vmatprep.subr.bf16.mxu1 %v707_v20 }
  0x2e   :  { %661 = vmatpush3.bf16.msra.mxu0 %v744_v47 }
  0x2f   :  { %662 = vmatprep.subr.bf16.mxu0 %v745_v48 }
  0x30   :  { %351 = vmatpush1.bf16.msra.mxu1 %v709_v21 }
  0x31   :  { %352 = vmatprep.subr.bf16.mxu1 %v710_v22 }
  0x32   :  { %663 = vmatpush3.bf16.msra.mxu0 %v746_v49  ;;  %v576_v49 = vand.u32 127, %v51_v51 }
  0x33   :  { %664 = vmatprep.subr.bf16.mxu0 %v747_v50 }
  0x34   :  { %353 = vmatpush1.bf16.msra.mxu1 %v712_v23  ;;  %vm577_vm1 = vcmp.lt.s32.totalorder %v576_v49, 4 }
  0x35   :  { %354 = vmatprep.subr.bf16.mxu1 %v713_v24 }
  0x36   :  { %665 = vmatpush3.bf16.msra.mxu0 %v748_v8 }
  0x37   :  { %666 = vmatprep.subr.bf16.mxu0 %v749_v9 }
  0x38   :  { %355 = vmatpush1.bf16.msra.mxu1 %v715_v25 }
  0x39   :  { %356 = vmatprep.subr.bf16.mxu1 %v716_v26 }
  0x3a   :  { %667 = vmatpush3.bf16.msra.mxu0 %v750_v10 }
  0x3b   :  { %668 = vmatprep.subr.bf16.mxu0 %v751_v11 }
  0x3c   :  { %357 = vmatpush1.bf16.msra.mxu1 %v718_v27 }
  0x3d   :  { %358 = vmatprep.subr.bf16.mxu1 %v719_v28 }
  0x3e   :  { %669 = vmatpush3.bf16.msra.mxu0 %v752_v12 }
  0x40   :  { %359 = vmatpush1.bf16.msra.mxu1 %v721_v29 }
  0x41   :  { %360 = vmatprep.subr.bf16.mxu1 %v722_v30 }
  0x44   :  { %361 = vmatpush1.bf16.msra.mxu1 %v724_v31  ;;  %v637_v31 = vld [vmem:[%s963_s6] ss:$0 sm:$0xff] }
  0x45   :  { %362 = vmatprep.subr.bf16.mxu1 %v725_v32 }
  0x48   :  { %363 = vmatpush1.bf16.msra.mxu1 %v727_v33 }
  0x49   :  { %364 = vmatprep.subr.bf16.mxu1 %v728_v34 }
  0x4c   :  { %365 = vmatpush1.bf16.msra.mxu1 %v730_v35 }
  0x4d   :  { %366 = vmatprep.subr.bf16.mxu1 %v731_v36 }
  0x50   :  { %367 = vmatpush1.bf16.msra.mxu1 %v733_v37 }
  0x51   :  { %368 = vmatprep.subr.bf16.mxu1 %v734_v38 }
  0x54   :  { %369 = vmatpush1.bf16.msra.mxu1 %v736_v39 }
  0xef   :  { %v119_v58 = vpop.f32.mrb[0].mxu0 }
  0xf0   :  { %v120_v59 = vadd.f32 %v119_v58, %v54_v56  ;;  %v121_v60 = vpop.f32.mrb[1].mxu0 }
  0xf1   :  { %v122_v61 = vadd.f32 %v121_v60, %v58_v57  ;;  %v123_v62 = vpop.f32.mrb[2].mxu0 }
  0xf2   :  { %v124_v63 = vadd.f32 %v123_v62, %v54_v56  ;;  %v125_v0 = vpop.f32.mrb[3].mxu0  ;;  %v128_v2 = vmax.f32 %v120_v59, 0.0 }
  0xf3   :  { %v126_v1 = vadd.f32 %v125_v0, %v58_v57  ;;  %v129_v4 = vmax.f32 %v122_v61, 0.0 }
  0xf4   :  { %v130_v3 = vmax.f32 %v124_v63, 0.0 }
  0xf5   :  { %v131_v5 = vmax.f32 %v126_v1, 0.0 }
  0xf6   :  { %v132_v6 = vpack.c.bf16 %v130_v3, %v128_v2 }
  0xf7   :  { %v133_v7 = vpack.c.bf16 %v131_v5, %v129_v4 }
  0xf9   :  { %370 = vmatprep.mubr.bf16.mxu1 %v133_v7 }
  0xfa   :  { %371 = vmatmul.mubr.bf16.vlgmr.msra.gmra.mrb[0].mxu1 %v132_v6 }
 0x1cd   :  { %v372_v16 = vpop.f32.mrb[0].mxu1 }
 0x1ce   :  { %v373_v17 = vadd.f32 %v372_v16, %v171_v14  ;;  %v374_v18 = vpop.f32.mrb[1].mxu1 }
 0x1cf   :  { %v375_v19 = vadd.f32 %v374_v18, %v175_v15  ;;  %v376_v20 = vpop.f32.mrb[2].mxu1 }
 0x1d0   :  { %v377_v21 = vadd.f32 %v376_v20, %v171_v14  ;;  %v378_v22 = vpop.f32.mrb[3].mxu1  ;;  %v381_v24 = vmax.f32 %v373_v17, 0.0 }
 0x1d1   :  { %v379_v23 = vadd.f32 %v378_v22, %v175_v15  ;;  %v382_v26 = vmax.f32 %v375_v19, 0.0 }
 0x1d2   :  { %v383_v25 = vmax.f32 %v377_v21, 0.0 }
 0x1d3   :  { %v384_v27 = vmax.f32 %v379_v23, 0.0 }
 0x1d4   :  { %v385_v28 = vpack.c.bf16 %v383_v25, %v381_v24 }
 0x1d5   :  { %v386_v29 = vpack.c.bf16 %v384_v27, %v382_v26 }
 0x1d7   :  { %554 = vmatprep.mubr.bf16.mxu0 %v386_v29 }
 0x1d8   :  { %555 = vmatmul.mubr.bf16.vlgmr.msra.gmra.mrb[4].mxu0 %v385_v28 }
 0x2ab   :  { %v670_v30 = vpop.f32.mrb[4].mxu0 }
 0x2ac   :  { %v671_v32 = vpop.f32.mrb[5].mxu0 }
 0x2ad   :  { %v672_v33 = vadd.f32 %v671_v32, %v670_v30  ;;  %v673_v34 = vpop.f32.mrb[6].mxu0 }
 0x2ae   :  { %v674_v35 = vpop.f32.mrb[7].mxu0 }
 0x2af   :  { %v557_v36 = vadd.f32 %v672_v33, %v637_v31  ;;  %v675_v37 = vadd.f32 %v674_v35, %v673_v34 }
 0x2b1   :  { %753 = vtanh.f32 %v557_v36  ;;  %v560_v38 = vadd.f32 %v675_v37, %v637_v31 }
 0x2b3   :  { %755 = vtanh.f32 %v560_v38 }
 0x2bb   :  { %v754_v39 = vpop.eup %753 }
 0x2bc   :  { %v565_v40 = vadd.f32 1.0, %v754_v39 }
 0x2bd   :  { %v756_v41 = vpop.eup %755 }
 0x2be   :  { %v567_v42 = vmul.f32 6.0, %v565_v40  ;;  %v566_v43 = vadd.f32 1.0, %v756_v41 }
 0x2c0   :  { %v569_v44 = vadd.f32 -10.0, %v567_v42  ;;  %v568_v45 = vmul.f32 6.0, %v566_v43 }
 0x2c2   :  { %v571_v46 = vmul.f32 1.442695, %v569_v44  ;;  %v570_v47 = vadd.f32 -10.0, %v568_v45 }
 0x2c4   :  { %757 = vpow2.f32 %v571_v46  ;;  %v573_v48 = vmul.f32 1.442695, %v570_v47 }
 0x2c6   :  { %759 = vpow2.f32 %v573_v48 }
 0x2ce   :  { %v758_v50 = vpop.eup %757 }
 0x2cf   :  { %v578_v52 = vsel %vm577_vm1, %v557_v36, %v758_v50 }
 0x2d0   :  { %v760_v53 = vpop.eup %759  ;;  %581 = vst.msk [vmem:[#allocation5] sm:$0xff] %vm580_vm2, %v578_v52 }
 0x2d1   :  { %v579_v54 = vsel %vm577_vm1, %v560_v38, %v760_v53 }
 0x2d2   :  { %582 = vst.msk [vmem:[#allocation5 + $0x8] sm:$0xff] %vm580_vm2, %v579_v54 }
 0x2d3   :  { %587 = vsyncadd [#allocation4], 224  ;;  %s813_s6 = smov [#allocation5]  }
 0x2d4   :  { %s588_s10 = sshll.u32 %s813_s6, 4  ;;  %s589_s10 = int_to_ptr.vmem [resolvable:$true] %s588_s10 }
 0x2d5   :  { %s783_s11 = scalar_lea.vmem %s589_s10, 32  ;;  %s787_s12 = scalar_lea.vmem %s589_s10, 256 }
 0x2d6   :  { %p784_p8 = scmp.ne.s32.totalorder %s589_s10, %s783_s11  ;;  %p788_p9 = scmp.lt.s32.totalorder %s589_s10, %s589_s10 }
 0x2d7   :  { %p789_p10 = scmp.lt.s32.totalorder %s787_s12, %s783_s11 }
 0x2d9   :  { %p790_p11 = por %p789_p10, %p788_p9 }
 0x2db   :  { %p791_p12 = pnand %p790_p11, %p784_p8 }
 0x2dd   :  { %794 = shalt.err (!%p791_p12)
}
 0x2de   :  { %s795_s15 = scalar_lea.hbm %s964_s7, 32 }
 0x2df   :  { %p796_p13 = scmp.ne.s32.totalorder %s964_s7, %s795_s15  ;;  %p799_p0 = scmp.lt.u32.totalorder %s795_s15, %s964_s7 }
 0x2e1   :  { %p801_p1 = pnand %p799_p0, %p796_p13 }
 0x2e3   :  { %804 = shalt.err (!%p801_p1)
}
 0x2e4   :  { %s814_s20 = smov 32   ;;  %s815_s21 = smov 2  }
 0x2e5   :  { %594 = dma.vmem_to_hbm [thread:$0]  %s589_s10, 32, %s964_s7, [#allocation4], %s814_s20, %s814_s20, %s815_s21  }
 0x2e6   :  { %807 = dma.done.wait [#allocation4], 256  }
 0x2e7   :  { %808 = vsyncadd [#allocation4], 4294967040 }
 0x2e8   :  { %598 = vsyncpa [#allocation3], 1 }
 0x2e9   :  { %599 = vsyncpa [#allocation4], 1 }

// kernel: tpu_custom_call.1
= control target key start
LH: loop header
LB: loop body
LE: loop exit
PB: predicated region body
PF: predicated region fallthrough
CT: control target
= control target key end

     0   :  { %12 = vsyncpa [#allocation3], 0  ;;  %s957_s0 = inlined_call_operand.vmem [shape: f32[2,32], index: 0, kind: input, shape index: {}]   ;;  %s958_s1 = inlined_call_operand.vmem [shape: bf16[32,256], index: 1, kind: input, shape index: {}]   ;;  %s959_s2 = inlined_call_operand.vmem [shape: f32[1,256], index: 2, kind: input, shape index: {}]   ;;  %s960_s3 = inlined_call_operand.hbm [shape: bf16[256,256], index: 3, kind: input, shape index: {}]   ;;  %s961_s4 = inlined_call_operand.vmem [shape: f32[1,256], index: 4, kind: input, shape index: {}]   ;;  %s962_s5 = inlined_call_operand.vmem [shape: bf16[256,8], index: 5, kind: input, shape index: {}]   ;;  %s963_s6 = inlined_call_operand.vmem [shape: f32[1,8], index: 6, kind: input, shape index: {}]   ;;  %s964_s7 = inlined_call_operand.hbm [shape: f32[2,8], index: 7, kind: output, shape index: {}]  }
   0x1   :  { %13 = vsyncpa [#allocation4], 0  ;;  %s809_s24 = smov [#allocation2]   ;;  %s761_s28 = scalar_lea.hbm %s960_s3, 4096 }
   0x2   :  { %s25_s25 = sshll.u32 %s809_s24, 4  ;;  %p762_p0 = scmp.ne.s32.totalorder %s960_s3, %s761_s28  ;;  %s26_s25 = int_to_ptr.vmem [resolvable:$true] %s25_s25 }
   0x3   :  { %p765_p1 = scmp.lt.u32.totalorder %s761_s28, %s960_s3 }
   0x5   :  { %p767_p2 = pnand %p765_p1, %p762_p0 }
   0x7   :  { %770 = shalt.err (!%p767_p2)
}
   0x8   :  { %s771_s10 = scalar_lea.vmem %s26_s25, 4096  ;;  %p776_p4 = scmp.lt.s32.totalorder %s26_s25, %s26_s25 }
   0x9   :  { %p772_p3 = scmp.ne.s32.totalorder %s26_s25, %s771_s10  ;;  %p777_p5 = scmp.lt.s32.totalorder %s771_s10, %s771_s10 }
   0xb   :  { %p778_p6 = por %p777_p5, %p776_p4 }
   0xd   :  { %p779_p7 = pnand %p778_p6, %p772_p3 }
   0xf   :  { %782 = shalt.err (!%p779_p7)
}
  0x10   :  { %s810_s11 = smov 128   ;;  %s811_s12 = smov 8  }
  0x11   :  { %31 = dma.hbm_to_vmem [thread:$0]  %s960_s3, 4096, %s26_s25, [#allocation3], %s810_s11, %s810_s11, %s811_s12  }
  0x12   :  { %805 = dma.done.wait [#allocation3], 4096  }
  0x13   :  { %806 = vsyncadd [#allocation3], 4294963200  ;;  %v812_v0 = vmov 0   ;;  %v683_v1 = vld [vmem:[%s958_s1 + $0x4] ss:$8 sps:$4 sm:$0xff]   ;;  %vm81_vm0 = vcmask 261120   ;;  %v51_v51 = vlaneseq }
  0x14   :  { %117 = vmatprep.mubr.bf16.mxu0 %v812_v0  ;;  %v685_v2 = vld [vmem:[%s958_s1] ss:$8 sps:$4 sm:$0xff]   ;;  %85 = vmatprep.subr.bf16.mxu0 %v683_v1  ;;  %v686_v3 = vld [vmem:[%s958_s1 + $0x14] ss:$8 sps:$4 sm:$0xff]   ;;  %v688_v4 = vld [vmem:[%s958_s1 + $0x10] ss:$8 sps:$4 sm:$0xff]  }
  0x15   :  { %v42_v5 = vld [vmem:[%s957_s0] sm:$0xff]  ;;  %86 = vmatpush1.bf16.msra.mxu0 %v685_v2  ;;  %v43_v6 = vld [vmem:[%s957_s0 + $0x8] sm:$0xff]  ;;  %v692_v9 = vld [vmem:[#allocation2 + $0x14] ss:$8 sps:$4 sm:$0xff]   ;;  %v52_v52 = vshrl.u32 %v51_v51, 7  ;;  %vm580_vm2 = vcmask 64512  }
  0x16   :  { %87 = vmatprep.subr.bf16.mxu0 %v686_v3  ;;  %v689_v7 = vld [vmem:[#allocation2 + $0x4] ss:$8 sps:$4 sm:$0xff]   ;;  %v691_v8 = vld [vmem:[#allocation2] ss:$8 sps:$4 sm:$0xff]   ;;  %v44_v10 = vpack.c.bf16 %v43_v6, %v42_v5  ;;  %v694_v11 = vld [vmem:[#allocation2 + $0x10] ss:$8 sps:$4 sm:$0xff]  }
  0x17   :  { %338 = vmatprep.subr.bf16.mxu1 %v689_v7  ;;  %v695_v12 = vld [vmem:[#allocation2 + $0x24] ss:$8 sps:$4 sm:$0xff]   ;;  %v697_v13 = vld [vmem:[#allocation2 + $0x20] ss:$8 sps:$4 sm:$0xff]   ;;  %v698_v14 = vld [vmem:[#allocation2 + $0x34] ss:$8 sps:$4 sm:$0xff]  }
  0x18   :  { %339 = vmatpush1.bf16.msra.mxu1 %v691_v8  ;;  %v700_v15 = vld [vmem:[#allocation2 + $0x30] ss:$8 sps:$4 sm:$0xff]   ;;  %v701_v16 = vld [vmem:[#allocation2 + $0x44] ss:$8 sps:$4 sm:$0xff]   ;;  %v703_v17 = vld [vmem:[#allocation2 + $0x40] ss:$8 sps:$4 sm:$0xff]  }
  0x19   :  { %88 = vmatpush1.bf16.msra.mxu0 %v688_v4  ;;  %340 = vmatprep.subr.bf16.mxu1 %v692_v9  ;;  %v704_v18 = vld [vmem:[#allocation2 + $0x54] ss:$8 sps:$4 sm:$0xff]   ;;  %v706_v19 = vld [vmem:[#allocation2 + $0x50] ss:$8 sps:$4 sm:$0xff]   ;;  %v707_v20 = vld [vmem:[#allocation2 + $0x64] ss:$8 sps:$4 sm:$0xff]  }
  0x1a   :  { %v709_v21 = vld [vmem:[#allocation2 + $0x60] ss:$8 sps:$4 sm:$0xff]   ;;  %v710_v22 = vld [vmem:[#allocation2 + $0x74] ss:$8 sps:$4 sm:$0xff]   ;;  %v712_v23 = vld [vmem:[#allocation2 + $0x70] ss:$8 sps:$4 sm:$0xff]  }
  0x1b   :  { %v713_v24 = vld [vmem:[#allocation2 + $0x84] ss:$8 sps:$4 sm:$0xff]   ;;  %v715_v25 = vld [vmem:[#allocation2 + $0x80] ss:$8 sps:$4 sm:$0xff]   ;;  %v716_v26 = vld [vmem:[#allocation2 + $0x94] ss:$8 sps:$4 sm:$0xff]  }
  0x1c   :  { %604 = vmatmul.mubr.msk.bf16.vlgmr.msra.gmra.mrb[0].mxu0 %vm81_vm0, %v44_v10  ;;  %341 = vmatpush1.bf16.msra.mxu1 %v694_v11  ;;  %v718_v27 = vld [vmem:[#allocation2 + $0x90] ss:$8 sps:$4 sm:$0xff]   ;;  %v719_v28 = vld [vmem:[#allocation2 + $0xa4] ss:$8 sps:$4 sm:$0xff]   ;;  %v721_v29 = vld [vmem:[#allocation2 + $0xa0] ss:$8 sps:$4 sm:$0xff]  }
  0x1d   :  { %342 = vmatprep.subr.bf16.mxu1 %v695_v12  ;;  %v722_v30 = vld [vmem:[#allocation2 + $0xb4] ss:$8 sps:$4 sm:$0xff]   ;;  %v724_v31 = vld [vmem:[#allocation2 + $0xb0] ss:$8 sps:$4 sm:$0xff]   ;;  %v725_v32 = vld [vmem:[#allocation2 + $0xc4] ss:$8 sps:$4 sm:$0xff]  }
  0x1e   :  { %v727_v33 = vld [vmem:[#allocation2 + $0xc0] ss:$8 sps:$4 sm:$0xff]   ;;  %v728_v34 = vld [vmem:[#allocation2 + $0xd4] ss:$8 sps:$4 sm:$0xff]   ;;  %v730_v35 = vld [vmem:[#allocation2 + $0xd0] ss:$8 sps:$4 sm:$0xff]  }
  0x1f   :  { %v731_v36 = vld [vmem:[#allocation2 + $0xe4] ss:$8 sps:$4 sm:$0xff]   ;;  %v733_v37 = vld [vmem:[#allocation2 + $0xe0] ss:$8 sps:$4 sm:$0xff]   ;;  %v734_v38 = vld [vmem:[#allocation2 + $0xf4] ss:$8 sps:$4 sm:$0xff]  }
  0x20   :  { %343 = vmatpush1.bf16.msra.mxu1 %v697_v13  ;;  %v736_v39 = vld [vmem:[#allocation2 + $0xf0] ss:$8 sps:$4 sm:$0xff]   ;;  %v737_v40 = vld [vmem:[%s962_s5 + $0x40] sm:$0xff]   ;;  %v739_v42 = vld [vmem:[%s962_s5 + $0x48] sm:$0xff]   ;;  %v53_v53 = vsub.s32 0, %v52_v52  ;;  %v57_v55 = vsub.s32 1, %v52_v52 }
  0x21   :  { %344 = vmatprep.subr.bf16.mxu1 %v698_v14  ;;  %v738_v41 = vld [vmem:[%s962_s5] sm:$0xff]   ;;  %654 = vmatprep.subr.bf16.mxu0 %v737_v40  ;;  %v740_v43 = vld [vmem:[%s962_s5 + $0x8] sm:$0xff]   ;;  %v741_v44 = vld [vmem:[%s962_s5 + $0x50] sm:$0xff]  }
  0x22   :  { %655 = vmatpush3.bf16.msra.mxu0 %v738_v41  ;;  %v742_v45 = vld [vmem:[%s962_s5 + $0x10] sm:$0xff]   ;;  %v743_v46 = vld [vmem:[%s962_s5 + $0x58] sm:$0xff]   ;;  %v745_v48 = vld [vmem:[%s962_s5 + $0x60] sm:$0xff]  }
  0x23   :  { %656 = vmatprep.subr.bf16.mxu0 %v739_v42  ;;  %v744_v47 = vld [vmem:[%s962_s5 + $0x18] sm:$0xff]   ;;  %v746_v49 = vld [vmem:[%s962_s5 + $0x20] sm:$0xff]   ;;  %v747_v50 = vld [vmem:[%s962_s5 + $0x68] sm:$0xff]  }
  0x24   :  { %345 = vmatpush1.bf16.msra.mxu1 %v700_v15  ;;  %v49_v54 = vld [vmem:[%s959_s2] sm:$0x3]  ;;  %v748_v8 = vld [vmem:[%s962_s5 + $0x28] sm:$0xff]   ;;  %v749_v9 = vld [vmem:[%s962_s5 + $0x70] sm:$0xff]  }
  0x25   :  { %346 = vmatprep.subr.bf16.mxu1 %v701_v16  ;;  %v54_v56 = vrot.slane %v49_v54, %v53_v53  ;;  %v58_v57 = vrot.slane %v49_v54, %v57_v55  ;;  %v750_v10 = vld [vmem:[%s962_s5 + $0x30] sm:$0xff]   ;;  %v751_v11 = vld [vmem:[%s962_s5 + $0x78] sm:$0xff]   ;;  %v166_v13 = vld [vmem:[%s961_s4] sm:$0x3] }
  0x26   :  { %657 = vmatpush3.bf16.msra.mxu0 %v740_v43  ;;  %v752_v12 = vld [vmem:[%s962_s5 + $0x38] sm:$0xff]   ;;  %v171_v14 = vrot.slane %v166_v13, %v53_v53  ;;  %v175_v15 = vrot.slane %v166_v13, %v57_v55 }
  0x27   :  { %658 = vmatprep.subr.bf16.mxu0 %v741_v44 }
  0x28   :  { %347 = vmatpush1.bf16.msra.mxu1 %v703_v17 }
  0x29   :  { %348 = vmatprep.subr.bf16.mxu1 %v704_v18 }
  0x2a   :  { %659 = vmatpush3.bf16.msra.mxu0 %v742_v45 }
  0x2b   :  { %660 = vmatprep.subr.bf16.mxu0 %v743_v46 }
  0x2c   :  { %349 = vmatpush1.bf16.msra.mxu1 %v706_v19 }
  0x2d   :  { %350 = vmatprep.subr.bf16.mxu1 %v707_v20 }
  0x2e   :  { %661 = vmatpush3.bf16.msra.mxu0 %v744_v47 }
  0x2f   :  { %662 = vmatprep.subr.bf16.mxu0 %v745_v48 }
  0x30   :  { %351 = vmatpush1.bf16.msra.mxu1 %v709_v21 }
  0x31   :  { %352 = vmatprep.subr.bf16.mxu1 %v710_v22 }
  0x32   :  { %663 = vmatpush3.bf16.msra.mxu0 %v746_v49  ;;  %v576_v49 = vand.u32 127, %v51_v51 }
  0x33   :  { %664 = vmatprep.subr.bf16.mxu0 %v747_v50 }
  0x34   :  { %353 = vmatpush1.bf16.msra.mxu1 %v712_v23  ;;  %vm577_vm1 = vcmp.lt.s32.totalorder %v576_v49, 4 }
  0x35   :  { %354 = vmatprep.subr.bf16.mxu1 %v713_v24 }
  0x36   :  { %665 = vmatpush3.bf16.msra.mxu0 %v748_v8 }
  0x37   :  { %666 = vmatprep.subr.bf16.mxu0 %v749_v9 }
  0x38   :  { %355 = vmatpush1.bf16.msra.mxu1 %v715_v25 }
  0x39   :  { %356 = vmatprep.subr.bf16.mxu1 %v716_v26 }
  0x3a   :  { %667 = vmatpush3.bf16.msra.mxu0 %v750_v10 }
  0x3b   :  { %668 = vmatprep.subr.bf16.mxu0 %v751_v11 }
  0x3c   :  { %357 = vmatpush1.bf16.msra.mxu1 %v718_v27 }
  0x3d   :  { %358 = vmatprep.subr.bf16.mxu1 %v719_v28 }
  0x3e   :  { %669 = vmatpush3.bf16.msra.mxu0 %v752_v12 }
  0x40   :  { %359 = vmatpush1.bf16.msra.mxu1 %v721_v29 }
  0x41   :  { %360 = vmatprep.subr.bf16.mxu1 %v722_v30 }
  0x44   :  { %361 = vmatpush1.bf16.msra.mxu1 %v724_v31  ;;  %v637_v31 = vld [vmem:[%s963_s6] ss:$0 sm:$0xff] }
  0x45   :  { %362 = vmatprep.subr.bf16.mxu1 %v725_v32 }
  0x48   :  { %363 = vmatpush1.bf16.msra.mxu1 %v727_v33 }
  0x49   :  { %364 = vmatprep.subr.bf16.mxu1 %v728_v34 }
  0x4c   :  { %365 = vmatpush1.bf16.msra.mxu1 %v730_v35 }
  0x4d   :  { %366 = vmatprep.subr.bf16.mxu1 %v731_v36 }
  0x50   :  { %367 = vmatpush1.bf16.msra.mxu1 %v733_v37 }
  0x51   :  { %368 = vmatprep.subr.bf16.mxu1 %v734_v38 }
  0x54   :  { %369 = vmatpush1.bf16.msra.mxu1 %v736_v39 }
  0xef   :  { %v119_v58 = vpop.f32.mrb[0].mxu0 }
  0xf0   :  { %v120_v59 = vadd.f32 %v119_v58, %v54_v56  ;;  %v121_v60 = vpop.f32.mrb[1].mxu0 }
  0xf1   :  { %v122_v61 = vadd.f32 %v121_v60, %v58_v57  ;;  %v123_v62 = vpop.f32.mrb[2].mxu0 }
  0xf2   :  { %v124_v63 = vadd.f32 %v123_v62, %v54_v56  ;;  %v125_v0 = vpop.f32.mrb[3].mxu0  ;;  %v128_v2 = vmax.f32 %v120_v59, 0.0 }
  0xf3   :  { %v126_v1 = vadd.f32 %v125_v0, %v58_v57  ;;  %v129_v4 = vmax.f32 %v122_v61, 0.0 }
  0xf4   :  { %v130_v3 = vmax.f32 %v124_v63, 0.0 }
  0xf5   :  { %v131_v5 = vmax.f32 %v126_v1, 0.0 }
  0xf6   :  { %v132_v6 = vpack.c.bf16 %v130_v3, %v128_v2 }
  0xf7   :  { %v133_v7 = vpack.c.bf16 %v131_v5, %v129_v4 }
  0xf9   :  { %370 = vmatprep.mubr.bf16.mxu1 %v133_v7 }
  0xfa   :  { %371 = vmatmul.mubr.bf16.vlgmr.msra.gmra.mrb[0].mxu1 %v132_v6 }
 0x1cd   :  { %v372_v16 = vpop.f32.mrb[0].mxu1 }
 0x1ce   :  { %v373_v17 = vadd.f32 %v372_v16, %v171_v14  ;;  %v374_v18 = vpop.f32.mrb[1].mxu1 }
 0x1cf   :  { %v375_v19 = vadd.f32 %v374_v18, %v175_v15  ;;  %v376_v20 = vpop.f32.mrb[2].mxu1 }
 0x1d0   :  { %v377_v21 = vadd.f32 %v376_v20, %v171_v14  ;;  %v378_v22 = vpop.f32.mrb[3].mxu1  ;;  %v381_v24 = vmax.f32 %v373_v17, 0.0 }
 0x1d1   :  { %v379_v23 = vadd.f32 %v378_v22, %v175_v15  ;;  %v382_v26 = vmax.f32 %v375_v19, 0.0 }
 0x1d2   :  { %v383_v25 = vmax.f32 %v377_v21, 0.0 }
 0x1d3   :  { %v384_v27 = vmax.f32 %v379_v23, 0.0 }
 0x1d4   :  { %v385_v28 = vpack.c.bf16 %v383_v25, %v381_v24 }
 0x1d5   :  { %v386_v29 = vpack.c.bf16 %v384_v27, %v382_v26 }
 0x1d7   :  { %554 = vmatprep.mubr.bf16.mxu0 %v386_v29 }
 0x1d8   :  { %555 = vmatmul.mubr.bf16.vlgmr.msra.gmra.mrb[4].mxu0 %v385_v28 }
 0x2ab   :  { %v670_v30 = vpop.f32.mrb[4].mxu0 }
 0x2ac   :  { %v671_v32 = vpop.f32.mrb[5].mxu0 }
 0x2ad   :  { %v672_v33 = vadd.f32 %v671_v32, %v670_v30  ;;  %v673_v34 = vpop.f32.mrb[6].mxu0 }
 0x2ae   :  { %v674_v35 = vpop.f32.mrb[7].mxu0 }
 0x2af   :  { %v557_v36 = vadd.f32 %v672_v33, %v637_v31  ;;  %v675_v37 = vadd.f32 %v674_v35, %v673_v34 }
 0x2b1   :  { %753 = vtanh.f32 %v557_v36  ;;  %v560_v38 = vadd.f32 %v675_v37, %v637_v31 }
 0x2b3   :  { %755 = vtanh.f32 %v560_v38 }
 0x2bb   :  { %v754_v39 = vpop.eup %753 }
 0x2bc   :  { %v565_v40 = vadd.f32 1.0, %v754_v39 }
 0x2bd   :  { %v756_v41 = vpop.eup %755 }
 0x2be   :  { %v567_v42 = vmul.f32 6.0, %v565_v40  ;;  %v566_v43 = vadd.f32 1.0, %v756_v41 }
 0x2c0   :  { %v569_v44 = vadd.f32 -10.0, %v567_v42  ;;  %v568_v45 = vmul.f32 6.0, %v566_v43 }
 0x2c2   :  { %v571_v46 = vmul.f32 1.442695, %v569_v44  ;;  %v570_v47 = vadd.f32 -10.0, %v568_v45 }
 0x2c4   :  { %757 = vpow2.f32 %v571_v46  ;;  %v573_v48 = vmul.f32 1.442695, %v570_v47 }
 0x2c6   :  { %759 = vpow2.f32 %v573_v48 }
 0x2ce   :  { %v758_v50 = vpop.eup %757 }
 0x2cf   :  { %v578_v52 = vsel %vm577_vm1, %v557_v36, %v758_v50 }
 0x2d0   :  { %v760_v53 = vpop.eup %759  ;;  %581 = vst.msk [vmem:[#allocation5] sm:$0xff] %vm580_vm2, %v578_v52 }
 0x2d1   :  { %v579_v54 = vsel %vm577_vm1, %v560_v38, %v760_v53 }
 0x2d2   :  { %582 = vst.msk [vmem:[#allocation5 + $0x8] sm:$0xff] %vm580_vm2, %v579_v54 }
 0x2d3   :  { %587 = vsyncadd [#allocation4], 224  ;;  %s813_s6 = smov [#allocation5]  }
 0x2d4   :  { %s588_s10 = sshll.u32 %s813_s6, 4  ;;  %s589_s10 = int_to_ptr.vmem [resolvable:$true] %s588_s10 }
 0x2d5   :  { %s783_s11 = scalar_lea.vmem %s589_s10, 32  ;;  %s787_s12 = scalar_lea.vmem %s589_s10, 256 }
 0x2d6   :  { %p784_p8 = scmp.ne.s32.totalorder %s589_s10, %s783_s11  ;;  %p788_p9 = scmp.lt.s32.totalorder %s589_s10, %s589_s10 }
 0x2d7   :  { %p789_p10 = scmp.lt.s32.totalorder %s787_s12, %s783_s11 }
 0x2d9   :  { %p790_p11 = por %p789_p10, %p788_p9 }
 0x2db   :  { %p791_p12 = pnand %p790_p11, %p784_p8 }
 0x2dd   :  { %794 = shalt.err (!%p791_p12)
}
 0x2de   :  { %s795_s15 = scalar_lea.hbm %s964_s7, 32 }
 0x2df   :  { %p796_p13 = scmp.ne.s32.totalorder %s964_s7, %s795_s15  ;;  %p799_p0 = scmp.lt.u32.totalorder %s795_s15, %s964_s7 }
 0x2e1   :  { %p801_p1 = pnand %p799_p0, %p796_p13 }
 0x2e3   :  { %804 = shalt.err (!%p801_p1)
}
 0x2e4   :  { %s814_s20 = smov 32   ;;  %s815_s21 = smov 2  }
 0x2e5   :  { %594 = dma.vmem_to_hbm [thread:$0]  %s589_s10, 32, %s964_s7, [#allocation4], %s814_s20, %s814_s20, %s815_s21  }
 0x2e6   :  { %807 = dma.done.wait [#allocation4], 256  }
 0x2e7   :  { %808 = vsyncadd [#allocation4], 4294967040 }
 0x2e8   :  { %598 = vsyncpa [#allocation3], 1 }
 0x2e9   :  { %599 = vsyncpa [#allocation4], 1 }

</bundles_post_ra>
